<compile_context>
chip_gen: v7x
topology: tpu7x:2x2x1
jax: 0.10.0
libtpu: 0.0.40
codegen_flags: <defaults>
</compile_context>

<pallas_src>
import functools

import jax
import jax.numpy as jnp
from jax.experimental import pallas as pl
from jax.experimental.pallas import tpu as pltpu


def _round_up(v, m):
    return (v + m - 1) // m * m


# ----------------------------------------------------------------------------
# Fused, batched forward kernel: one grid step processes TB graphs.
# ----------------------------------------------------------------------------
def graph_vae_kernel(
    abig_ref,   # (TB*N, TB*N)  block-diag normalized adjacency  kron(I_TB, A)
    pool_ref,   # (TB,  TB*N)   per-graph mean-pool matrix (1/N entries)
    x_ref,      # (TB*N, Cin)   stacked node features of TB graphs
    w1_ref,     # (Cin, H)      GCN conv1 weight
    w2_ref,     # (H,  H)       GCN conv2 weight
    whead_ref,  # (H,  2L)      fused [w_mu | w_logvar]
    dw1_ref,    # (L,  H)       decoder fc1 weight
    dw2_ref,    # (H,  N*Cin)   decoder fc2 weight
    pack_ref,   # (8, PADW)     rows: b1, b2, bhead(2L), db1, db2(N*Cin)
    eps_ref,    # (TB, L)       reparameterization noise
    out_ref,    # (TB, OUT_PAD) lane-dense slab: [recon | mu | logvar | 0 pad]
    *, hidden, latent, n_out, tb,
):
    f32 = jnp.float32
    relu = lambda v: jnp.maximum(v, 0.0)

    # biases (one packed 4 KiB buffer, static-offset slices)
    b1 = pack_ref[0:1, :hidden]
    b2 = pack_ref[1:2, :hidden]
    bhead = pack_ref[2:3, : 2 * latent]
    db1 = pack_ref[3:4, :hidden]
    db2 = pack_ref[4:5, :n_out]

    a = abig_ref[...]
    x = x_ref[...]

    # --- encoder: GCNConv(in, H) -> relu   (A @ (X @ W) + b, all on MXU) ---
    h = relu(
        jnp.dot(a, jnp.dot(x, w1_ref[...], preferred_element_type=f32),
                preferred_element_type=f32) + b1)
    # --- encoder: GCNConv(H, H) -> relu ---
    h = relu(
        jnp.dot(a, jnp.dot(h, w2_ref[...], preferred_element_type=f32),
                preferred_element_type=f32) + b2)

    # --- per-graph mean over nodes, folded into the MXU ---
    pooled = jnp.dot(pool_ref[...], h, preferred_element_type=f32)   # (TB, H)

    # --- fused fc_mu / fc_logvar head ---
    head = jnp.dot(pooled, whead_ref[...], preferred_element_type=f32) + bhead
    mu = head[:, :latent]
    logvar = head[:, latent: 2 * latent]

    # --- reparameterize ---
    z = mu + eps_ref[...] * jnp.exp(0.5 * logvar)                     # (TB, L)

    # --- decoder MLP ---
    d1 = relu(jnp.dot(z, dw1_ref[...], preferred_element_type=f32) + db1)
    recon = jnp.dot(d1, dw2_ref[...], preferred_element_type=f32) + db2

    # --- single lane-dense output slab ---
    parts = [recon, mu, logvar]
    pad = out_ref.shape[1] - (n_out + 2 * latent)
    if pad:
        parts.append(jnp.zeros((tb, pad), f32))
    out_ref[...] = jnp.concatenate(parts, axis=1)


# ----------------------------------------------------------------------------
# Static (per-topology / per-params) preprocessing — NOT on the per-call path.
# ----------------------------------------------------------------------------
def gcn_norm_adjacency(edge_index, num_nodes):
    """Dense D^-1/2 (A + I_remaining) D^-1/2 from a [2, E] edge_index.

    Matches PyG GCNConv normalization incl. add_remaining_self_loops: a self
    loop is only added for nodes that don't already carry one.
    """
    # TODO(synk): scatter-add adjacency build has no clean BlockSpec form; it
    # is static per graph topology so it stays in plain-JAX glue, off the hot path.
    src, dst = edge_index[0], edge_index[1]
    a = jnp.zeros((num_nodes, num_nodes), jnp.float32).at[dst, src].add(1.0)
    diag = jnp.diagonal(a)
    a = a + jnp.diag(jnp.where(diag > 0.0, 0.0, 1.0))
    deg = a.sum(axis=1)
    dinv = jnp.where(deg > 0, 1.0 / jnp.sqrt(deg), 0.0)
    return dinv[:, None] * a * dinv[None, :]


def build_static(a_norm, num_nodes, tb):
    """Block-diagonal adjacency and mean-pool matrix for a tile of tb graphs."""
    eye = jnp.eye(tb, dtype=jnp.float32)
    a_big = jnp.kron(eye, a_norm)                                     # (tb*N, tb*N)
    pool = jnp.kron(eye, jnp.full((1, num_nodes), 1.0 / num_nodes,
                                  jnp.float32))                       # (tb, tb*N)
    return a_big, pool


def pack_params(params, num_nodes, in_channels):
    """Fuse mu/logvar head; pack all bias vectors into one (8, PADW) buffer."""
    hidden = params["w1"].shape[1]
    latent = params["wmu"].shape[1]
    n_out = num_nodes * in_channels
    padw = _round_up(max(hidden, 2 * latent, n_out), 128)

    def row(v):
        v = v.reshape(1, -1)
        return jnp.pad(v, ((0, 0), (0, padw - v.shape[1])))

    whead = jnp.concatenate([params["wmu"], params["wlv"]], axis=1)   # (H, 2L)
    bhead = jnp.concatenate([params["bmu"], params["blv"]], axis=1)   # (1, 2L)
    pack = jnp.concatenate(
        [row(params["b1"]), row(params["b2"]), row(bhead),
         row(params["db1"]), row(params["db2"]),
         jnp.zeros((3, padw), jnp.float32)],                          # pad to 8 rows
        axis=0)
    return {
        "w1": params["w1"], "w2": params["w2"], "whead": whead,
        "dw1": params["dw1"], "dw2": params["dw2"], "pack": pack,
    }


# ----------------------------------------------------------------------------
# Batched forward
# ----------------------------------------------------------------------------
@functools.partial(jax.jit, static_argnames=("num_nodes", "in_channels", "tb"))
def graph_vae_forward(x, eps, a_big, pool, packed, *, num_nodes, in_channels, tb):
    """x: (B, N, Cin) f32, eps: (B, L) f32.
    Returns (recon (B, N, Cin), mu (B, L), logvar (B, L)); each sample b is the
    GraphVAE forward of graph b with reparameterization noise eps[b]."""
    b, n, cin = x.shape
    assert n == num_nodes and cin == in_channels
    hidden = packed["w1"].shape[1]
    latent = packed["dw1"].shape[0]
    n_out = num_nodes * in_channels
    out_pad = _round_up(n_out + 2 * latent, 128)

    # pad batch to a multiple of the tile size
    b_pad = _round_up(b, tb)
    if b_pad != b:
        x = jnp.pad(x, ((0, b_pad - b), (0, 0), (0, 0)))
        eps = jnp.pad(eps, ((0, b_pad - b), (0, 0)))
    xs = x.reshape(b_pad * num_nodes, in_channels)

    tbn = tb * num_nodes
    const = lambda g: (0, 0)
    kernel = functools.partial(
        graph_vae_kernel, hidden=hidden, latent=latent, n_out=n_out, tb=tb)

    out = pl.pallas_call(
        kernel,
        out_shape=jax.ShapeDtypeStruct((b_pad, out_pad), jnp.float32),
        grid=(b_pad // tb,),
        in_specs=[
            pl.BlockSpec((tbn, tbn), const),                       # A block-diag
            pl.BlockSpec((tb, tbn), const),                        # pool matrix
            pl.BlockSpec((tbn, in_channels), lambda g: (g, 0)),    # x tile
            pl.BlockSpec(packed["w1"].shape, const),
            pl.BlockSpec(packed["w2"].shape, const),
            pl.BlockSpec(packed["whead"].shape, const),
            pl.BlockSpec(packed["dw1"].shape, const),
            pl.BlockSpec(packed["dw2"].shape, const),
            pl.BlockSpec(packed["pack"].shape, const),             # packed biases
            pl.BlockSpec((tb, latent), lambda g: (g, 0)),          # eps tile
        ],
        out_specs=pl.BlockSpec((tb, out_pad), lambda g: (g, 0)),
        compiler_params=pltpu.CompilerParams(
            dimension_semantics=("parallel",)),
    )(a_big, pool, xs, packed["w1"], packed["w2"], packed["whead"],
      packed["dw1"], packed["dw2"], packed["pack"], eps)

    out = out[:b]
    recon = out[:, :n_out].reshape(b, num_nodes, in_channels)
    mu = out[:, n_out: n_out + latent]
    logvar = out[:, n_out + latent: n_out + 2 * latent]
    return recon, mu, logvar


# ----------------------------------------------------------------------------
# Plain-JAX reference (single graph) and params
# ----------------------------------------------------------------------------
def reference_forward(x, a_norm, params, eps):
    h = jax.nn.relu(a_norm @ (x @ params["w1"]) + params["b1"])
    h = jax.nn.relu(a_norm @ (h @ params["w2"]) + params["b2"])
    pooled = h.mean(axis=0, keepdims=True)
    mu = pooled @ params["wmu"] + params["bmu"]
    logvar = pooled @ params["wlv"] + params["blv"]
    z = mu + eps * jnp.exp(0.5 * logvar)
    d1 = jax.nn.relu(z @ params["dw1"] + params["db1"])
    recon = (d1 @ params["dw2"] + params["db2"]).reshape(x.shape)
    return recon, mu[0], logvar[0]


def init_params(key, in_channels, hidden_dim, latent_dim, num_nodes):
    ks = jax.random.split(key, 7)
    scale = 0.1

    def w(k, shape):
        return (scale * jax.random.normal(k, shape)).astype(jnp.float32)

    return {
        "w1": w(ks[0], (in_channels, hidden_dim)),
        "b1": jnp.zeros((1, hidden_dim), jnp.float32),
        "w2": w(ks[1], (hidden_dim, hidden_dim)),
        "b2": jnp.zeros((1, hidden_dim), jnp.float32),
        "wmu": w(ks[2], (hidden_dim, latent_dim)),
        "bmu": jnp.zeros((1, latent_dim), jnp.float32),
        "wlv": w(ks[3], (hidden_dim, latent_dim)),
        "blv": jnp.zeros((1, latent_dim), jnp.float32),
        "dw1": w(ks[4], (latent_dim, hidden_dim)),
        "db1": jnp.zeros((1, hidden_dim), jnp.float32),
        "dw2": w(ks[5], (hidden_dim, num_nodes * in_channels)),
        "db2": jnp.zeros((1, num_nodes * in_channels), jnp.float32),
    }


if __name__ == "__main__":
    num_nodes = 8
    in_channels = 4
    hidden_dim = 32
    latent_dim = 16
    TB = 16            # graphs per grid step -> 128-row stacked matmul LHS
    B = 32             # batch of graphs / samples

    key = jax.random.PRNGKey(0)
    k_x, k_p, k_eps = jax.random.split(key, 3)

    x = jax.random.normal(k_x, (B, num_nodes, in_channels), dtype=jnp.float32)
    eps = jax.random.normal(k_eps, (B, latent_dim), dtype=jnp.float32)

    # small deterministic edge list (2, E): ring + chords (shared topology)
    edge_index = jnp.array(
        [
            [0, 1, 1, 2, 2, 3, 3, 4, 4, 5, 5, 6, 6, 7, 7, 0, 0, 4, 2, 6],
            [1, 0, 2, 1, 3, 2, 4, 3, 5, 4, 6, 5, 7, 6, 0, 7, 4, 0, 6, 2],
        ],
        dtype=jnp.int32,
    )

    params = init_params(k_p, in_channels, hidden_dim, latent_dim, num_nodes)

    # --- static preprocessing (once per topology / params, off the hot path) ---
    a_norm = gcn_norm_adjacency(edge_index, num_nodes)
    a_big, pool = build_static(a_norm, num_nodes, TB)
    packed = pack_params(params, num_nodes, in_channels)

    recon, mu, logvar = graph_vae_forward(
        x, eps, a_big, pool, packed,
        num_nodes=num_nodes, in_channels=in_channels, tb=TB)
    jax.block_until_ready((recon, mu, logvar))

    assert recon.shape == (B, num_nodes, in_channels)
    assert mu.shape == (B, latent_dim)
    assert logvar.shape == (B, latent_dim)

    # numerical check vs plain-JAX single-graph reference on a few samples
    def close(a, b, tol=5e-3):
        return float(jnp.max(jnp.abs(a - b))) < tol

    for b in (0, B // 2, B - 1):
        ref_r, ref_m, ref_lv = reference_forward(x[b], a_norm, params, eps[b:b + 1])
        assert close(recon[b], ref_r), f"recon mismatch at sample {b}"
        assert close(mu[b], ref_m), f"mu mismatch at sample {b}"
        assert close(logvar[b], ref_lv), f"logvar mismatch at sample {b}"

    print("KERNEL_OK")
</pallas_src>

<mosaic_0001>
module attributes {stable_mosaic.version = 11 : i64} {
  func.func @graph_vae_kernel(%arg0: i32, %arg1: memref<128x128xf32, #tpu.memory_space<vmem>>, %arg2: memref<16x128xf32, #tpu.memory_space<vmem>>, %arg3: memref<128x4xf32, #tpu.memory_space<vmem>>, %arg4: memref<4x32xf32, #tpu.memory_space<vmem>>, %arg5: memref<32x32xf32, #tpu.memory_space<vmem>>, %arg6: memref<32x32xf32, #tpu.memory_space<vmem>>, %arg7: memref<16x32xf32, #tpu.memory_space<vmem>>, %arg8: memref<32x32xf32, #tpu.memory_space<vmem>>, %arg9: memref<8x128xf32, #tpu.memory_space<vmem>>, %arg10: memref<16x16xf32, #tpu.memory_space<vmem>>, %arg11: memref<16x128xf32, #tpu.memory_space<vmem>>) attributes {dimension_semantics = [#tpu.dimension_semantics<parallel>], iteration_bounds = array<i64: 2>, scalar_prefetch = 0 : i64, scratch_operands = 0 : i64, tpu.core_type = #tpu.core_type<tc>, window_params = [{pipeline_mode = #tpu.pipeline_mode<synchronous>, transform_indices = @transform_0, window_bounds = array<i64: 128, 128>}, {pipeline_mode = #tpu.pipeline_mode<synchronous>, transform_indices = @transform_1, window_bounds = array<i64: 16, 128>}, {transform_indices = @transform_2, window_bounds = array<i64: 128, 4>}, {pipeline_mode = #tpu.pipeline_mode<synchronous>, transform_indices = @transform_3, window_bounds = array<i64: 4, 32>}, {pipeline_mode = #tpu.pipeline_mode<synchronous>, transform_indices = @transform_4, window_bounds = array<i64: 32, 32>}, {pipeline_mode = #tpu.pipeline_mode<synchronous>, transform_indices = @transform_5, window_bounds = array<i64: 32, 32>}, {pipeline_mode = #tpu.pipeline_mode<synchronous>, transform_indices = @transform_6, window_bounds = array<i64: 16, 32>}, {pipeline_mode = #tpu.pipeline_mode<synchronous>, transform_indices = @transform_7, window_bounds = array<i64: 32, 32>}, {pipeline_mode = #tpu.pipeline_mode<synchronous>, transform_indices = @transform_8, window_bounds = array<i64: 8, 128>}, {transform_indices = @transform_9, window_bounds = array<i64: 16, 16>}, {transform_indices = @transform_10, window_bounds = array<i64: 16, 128>}]} {
    %c0 = arith.constant 0 : index
    %c0_0 = arith.constant 0 : index
    %0 = vector.load %arg9[%c0, %c0_0] : memref<8x128xf32, #tpu.memory_space<vmem>>, vector<1x32xf32>
    %c1 = arith.constant 1 : index
    %c0_1 = arith.constant 0 : index
    %1 = vector.load %arg9[%c1, %c0_1] : memref<8x128xf32, #tpu.memory_space<vmem>>, vector<1x32xf32>
    %c2 = arith.constant 2 : index
    %c0_2 = arith.constant 0 : index
    %2 = vector.load %arg9[%c2, %c0_2] : memref<8x128xf32, #tpu.memory_space<vmem>>, vector<1x32xf32>
    %c3 = arith.constant 3 : index
    %c0_3 = arith.constant 0 : index
    %3 = vector.load %arg9[%c3, %c0_3] : memref<8x128xf32, #tpu.memory_space<vmem>>, vector<1x32xf32>
    %c4 = arith.constant 4 : index
    %c0_4 = arith.constant 0 : index
    %4 = vector.load %arg9[%c4, %c0_4] : memref<8x128xf32, #tpu.memory_space<vmem>>, vector<1x32xf32>
    %c0_5 = arith.constant 0 : index
    %c0_6 = arith.constant 0 : index
    %5 = vector.load %arg1[%c0_5, %c0_6] : memref<128x128xf32, #tpu.memory_space<vmem>>, vector<128x128xf32>
    %c0_7 = arith.constant 0 : index
    %c0_8 = arith.constant 0 : index
    %6 = vector.load %arg3[%c0_7, %c0_8] : memref<128x4xf32, #tpu.memory_space<vmem>>, vector<128x4xf32>
    %c0_9 = arith.constant 0 : index
    %c0_10 = arith.constant 0 : index
    %7 = vector.load %arg4[%c0_9, %c0_10] : memref<4x32xf32, #tpu.memory_space<vmem>>, vector<4x32xf32>
    %cst = arith.constant dense<0.000000e+00> : vector<128x32xf32>
    %8 = tpu.matmul %6, %7, %cst {dimension_numbers = #tpu.dot_dimension_numbers<[1], [0], [0], [1], [0, 0, 1, 1], [], []>} : vector<128x4xf32>, vector<4x32xf32>, vector<128x32xf32> -> vector<128x32xf32>
    %cst_11 = arith.constant dense<0.000000e+00> : vector<128x32xf32>
    %9 = tpu.matmul %5, %8, %cst_11 {dimension_numbers = #tpu.dot_dimension_numbers<[1], [0], [0], [1], [0, 0, 1, 1], [], []>} : vector<128x128xf32>, vector<128x32xf32>, vector<128x32xf32> -> vector<128x32xf32>
    %10 = vector.broadcast %0 : vector<1x32xf32> to vector<128x32xf32>
    %11 = arith.addf %9, %10 : vector<128x32xf32>
    %cst_12 = arith.constant 0.000000e+00 : f32
    %12 = vector.broadcast %cst_12 : f32 to vector<128x32xf32>
    %13 = arith.maximumf %11, %12 : vector<128x32xf32>
    %c0_13 = arith.constant 0 : index
    %c0_14 = arith.constant 0 : index
    %14 = vector.load %arg5[%c0_13, %c0_14] : memref<32x32xf32, #tpu.memory_space<vmem>>, vector<32x32xf32>
    %cst_15 = arith.constant dense<0.000000e+00> : vector<128x32xf32>
    %15 = tpu.matmul %13, %14, %cst_15 {dimension_numbers = #tpu.dot_dimension_numbers<[1], [0], [0], [1], [0, 0, 1, 1], [], []>} : vector<128x32xf32>, vector<32x32xf32>, vector<128x32xf32> -> vector<128x32xf32>
    %cst_16 = arith.constant dense<0.000000e+00> : vector<128x32xf32>
    %16 = tpu.matmul %5, %15, %cst_16 {dimension_numbers = #tpu.dot_dimension_numbers<[1], [0], [0], [1], [0, 0, 1, 1], [], []>} : vector<128x128xf32>, vector<128x32xf32>, vector<128x32xf32> -> vector<128x32xf32>
    %17 = vector.broadcast %1 : vector<1x32xf32> to vector<128x32xf32>
    %18 = arith.addf %16, %17 : vector<128x32xf32>
    %cst_17 = arith.constant 0.000000e+00 : f32
    %19 = vector.broadcast %cst_17 : f32 to vector<128x32xf32>
    %20 = arith.maximumf %18, %19 : vector<128x32xf32>
    %c0_18 = arith.constant 0 : index
    %c0_19 = arith.constant 0 : index
    %21 = vector.load %arg2[%c0_18, %c0_19] : memref<16x128xf32, #tpu.memory_space<vmem>>, vector<16x128xf32>
    %cst_20 = arith.constant dense<0.000000e+00> : vector<16x32xf32>
    %22 = tpu.matmul %21, %20, %cst_20 {dimension_numbers = #tpu.dot_dimension_numbers<[1], [0], [0], [1], [0, 0, 1, 1], [], []>} : vector<16x128xf32>, vector<128x32xf32>, vector<16x32xf32> -> vector<16x32xf32>
    %c0_21 = arith.constant 0 : index
    %c0_22 = arith.constant 0 : index
    %23 = vector.load %arg6[%c0_21, %c0_22] : memref<32x32xf32, #tpu.memory_space<vmem>>, vector<32x32xf32>
    %cst_23 = arith.constant dense<0.000000e+00> : vector<16x32xf32>
    %24 = tpu.matmul %22, %23, %cst_23 {dimension_numbers = #tpu.dot_dimension_numbers<[1], [0], [0], [1], [0, 0, 1, 1], [], []>} : vector<16x32xf32>, vector<32x32xf32>, vector<16x32xf32> -> vector<16x32xf32>
    %25 = vector.broadcast %2 : vector<1x32xf32> to vector<16x32xf32>
    %26 = arith.addf %24, %25 : vector<16x32xf32>
    %27 = vector.extract_strided_slice %26 {offsets = [0, 0], sizes = [16, 16], strides = [1, 1]} : vector<16x32xf32> to vector<16x16xf32>
    %28 = vector.extract_strided_slice %26 {offsets = [0, 16], sizes = [16, 16], strides = [1, 1]} : vector<16x32xf32> to vector<16x16xf32>
    %c0_24 = arith.constant 0 : index
    %c0_25 = arith.constant 0 : index
    %29 = vector.load %arg10[%c0_24, %c0_25] : memref<16x16xf32, #tpu.memory_space<vmem>>, vector<16x16xf32>
    %cst_26 = arith.constant 5.000000e-01 : f32
    %30 = vector.broadcast %cst_26 : f32 to vector<16x16xf32>
    %31 = arith.mulf %30, %28 : vector<16x16xf32>
    %32 = math.exp %31 : vector<16x16xf32>
    %33 = arith.mulf %29, %32 : vector<16x16xf32>
    %34 = arith.addf %27, %33 : vector<16x16xf32>
    %c0_27 = arith.constant 0 : index
    %c0_28 = arith.constant 0 : index
    %35 = vector.load %arg7[%c0_27, %c0_28] : memref<16x32xf32, #tpu.memory_space<vmem>>, vector<16x32xf32>
    %cst_29 = arith.constant dense<0.000000e+00> : vector<16x32xf32>
    %36 = tpu.matmul %34, %35, %cst_29 {dimension_numbers = #tpu.dot_dimension_numbers<[1], [0], [0], [1], [0, 0, 1, 1], [], []>} : vector<16x16xf32>, vector<16x32xf32>, vector<16x32xf32> -> vector<16x32xf32>
    %37 = vector.broadcast %3 : vector<1x32xf32> to vector<16x32xf32>
    %38 = arith.addf %36, %37 : vector<16x32xf32>
    %cst_30 = arith.constant 0.000000e+00 : f32
    %39 = vector.broadcast %cst_30 : f32 to vector<16x32xf32>
    %40 = arith.maximumf %38, %39 : vector<16x32xf32>
    %c0_31 = arith.constant 0 : index
    %c0_32 = arith.constant 0 : index
    %41 = vector.load %arg8[%c0_31, %c0_32] : memref<32x32xf32, #tpu.memory_space<vmem>>, vector<32x32xf32>
    %cst_33 = arith.constant dense<0.000000e+00> : vector<16x32xf32>
    %42 = tpu.matmul %40, %41, %cst_33 {dimension_numbers = #tpu.dot_dimension_numbers<[1], [0], [0], [1], [0, 0, 1, 1], [], []>} : vector<16x32xf32>, vector<32x32xf32>, vector<16x32xf32> -> vector<16x32xf32>
    %43 = vector.broadcast %4 : vector<1x32xf32> to vector<16x32xf32>
    %44 = arith.addf %42, %43 : vector<16x32xf32>
    %cst_34 = arith.constant 0.000000e+00 : f32
    %45 = vector.broadcast %cst_34 : f32 to vector<16x64xf32>
    %46 = tpu.concatenate %44, %27, %28, %45 in 1 : vector<16x32xf32>, vector<16x16xf32>, vector<16x16xf32>, vector<16x64xf32> -> vector<16x128xf32>
    %c0_35 = arith.constant 0 : index
    %c0_36 = arith.constant 0 : index
    %47 = vector.load %arg11[%c0_35, %c0_36] : memref<16x128xf32, #tpu.memory_space<vmem>>, vector<16x128xf32>
    tpu.vector_store %arg11[%c0_35, %c0_36], %46 {strides = array<i32>} : memref<16x128xf32, #tpu.memory_space<vmem>>, vector<16x128xf32>,
    return
  }
  func.func @transform_0(%arg0: i32) -> (i32, i32) {
    %c0_i32 = arith.constant 0 : i32
    %c0_i32_0 = arith.constant 0 : i32
    %c0_i32_1 = arith.constant 0 : i32
    return %c0_i32, %c0_i32_0 : i32, i32
  }
  func.func @transform_1(%arg0: i32) -> (i32, i32) {
    %c0_i32 = arith.constant 0 : i32
    %c0_i32_0 = arith.constant 0 : i32
    %c0_i32_1 = arith.constant 0 : i32
    return %c0_i32, %c0_i32_0 : i32, i32
  }
  func.func @transform_2(%arg0: i32) -> (i32, i32) {
    %c0_i32 = arith.constant 0 : i32
    %c0_i32_0 = arith.constant 0 : i32
    return %arg0, %c0_i32 : i32, i32
  }
  func.func @transform_3(%arg0: i32) -> (i32, i32) {
    %c0_i32 = arith.constant 0 : i32
    %c0_i32_0 = arith.constant 0 : i32
    %c0_i32_1 = arith.constant 0 : i32
    return %c0_i32, %c0_i32_0 : i32, i32
  }
  func.func @transform_4(%arg0: i32) -> (i32, i32) {
    %c0_i32 = arith.constant 0 : i32
    %c0_i32_0 = arith.constant 0 : i32
    %c0_i32_1 = arith.constant 0 : i32
    return %c0_i32, %c0_i32_0 : i32, i32
  }
  func.func @transform_5(%arg0: i32) -> (i32, i32) {
    %c0_i32 = arith.constant 0 : i32
    %c0_i32_0 = arith.constant 0 : i32
    %c0_i32_1 = arith.constant 0 : i32
    return %c0_i32, %c0_i32_0 : i32, i32
  }
  func.func @transform_6(%arg0: i32) -> (i32, i32) {
    %c0_i32 = arith.constant 0 : i32
    %c0_i32_0 = arith.constant 0 : i32
    %c0_i32_1 = arith.constant 0 : i32
    return %c0_i32, %c0_i32_0 : i32, i32
  }
  func.func @transform_7(%arg0: i32) -> (i32, i32) {
    %c0_i32 = arith.constant 0 : i32
    %c0_i32_0 = arith.constant 0 : i32
    %c0_i32_1 = arith.constant 0 : i32
    return %c0_i32, %c0_i32_0 : i32, i32
  }
  func.func @transform_8(%arg0: i32) -> (i32, i32) {
    %c0_i32 = arith.constant 0 : i32
    %c0_i32_0 = arith.constant 0 : i32
    %c0_i32_1 = arith.constant 0 : i32
    return %c0_i32, %c0_i32_0 : i32, i32
  }
  func.func @transform_9(%arg0: i32) -> (i32, i32) {
    %c0_i32 = arith.constant 0 : i32
    %c0_i32_0 = arith.constant 0 : i32
    return %arg0, %c0_i32 : i32, i32
  }
  func.func @transform_10(%arg0: i32) -> (i32, i32) {
    %c0_i32 = arith.constant 0 : i32
    %c0_i32_0 = arith.constant 0 : i32
    return %arg0, %c0_i32 : i32, i32
  }
}

</mosaic_0001>

<bundles_post_ra>
// kernel: graph_vae_forward.1
= control target key start
LH: loop header
LB: loop body
LE: loop exit
PB: predicated region body
PF: predicated region fallthrough
CT: control target
= control target key end

     0   :  { %s2229_s13 = smov 0   ;;  %s2512_s0 = inlined_call_operand.vmem [shape: f32[128,128], index: 0, kind: input, shape index: {}]   ;;  %s2513_s1 = inlined_call_operand.vmem [shape: f32[16,128], index: 1, kind: input, shape index: {}]   ;;  %s2514_s2 = inlined_call_operand.vmem [shape: f32[256,4], index: 2, kind: input, shape index: {}]   ;;  %s2515_s3 = inlined_call_operand.vmem [shape: f32[4,32], index: 3, kind: input, shape index: {}]   ;;  %s2516_s4 = inlined_call_operand.vmem [shape: f32[32,32], index: 4, kind: input, shape index: {}]   ;;  %s2517_s5 = inlined_call_operand.vmem [shape: f32[32,32], index: 5, kind: input, shape index: {}]   ;;  %s2518_s6 = inlined_call_operand.vmem [shape: f32[16,32], index: 6, kind: input, shape index: {}]   ;;  %s2519_s7 = inlined_call_operand.vmem [shape: f32[32,32], index: 7, kind: input, shape index: {}]   ;;  %s2520_s8 = inlined_call_operand.vmem [shape: f32[8,128], index: 8, kind: input, shape index: {}]   ;;  %s2521_s9 = inlined_call_operand.vmem [shape: f32[32,16], index: 9, kind: input, shape index: {}]   ;;  %s2522_s10 = inlined_call_operand.vmem [shape: f32[32,128], index: 10, kind: output, shape index: {}]  }
   0x1 LB: > { %s1600_s14 = sadd.s32 4294967295, %s2170_s13   ;;  %p1604_p0 = scmp.ge.s32.totalorder %s2170_s13, 1  ;;  %s2170_s13 = sphi %s2229_s13, %s20_s13  }
   0x2   : > { %p324_p1 = scmp.lt.s32.totalorder %s2170_s13, 3 }
   0x4   : > { %p325_p2 = pnand %p1604_p0, %p324_p1 }
   0x5   : > { %v422_v0 = vld [vmem:[%s2515_s3] sm:$0xf] (!%p325_p2)  ;;  %vm472_vm0 = vcmask (!%p325_p2), 1043456   ;;  %s1605_s17 = sshll.u32 (!%p325_p2), %s1600_s14, 4  ;;  %vm423_vm1 = vcmask (!%p325_p2), 31744   ;;  %v787_v19 = vld [vmem:[%s2516_s4 + $0x8] sm:$0xff] (!%p325_p2) }
   0x6   : > { %328 = sbr.rel (%p325_p2) target bundleno = 1985 (0x7c1), region = 60  ;;  %1792 = vmatprep.subr.msk.mxu0 (!%p325_p2), %vm472_vm0, %v422_v0  ;;  %p368_p3 = scmp.lt.s32.totalorder (!%p325_p2), %s1605_s17, 31  ;;  %v2282_v17 = vld [vmem:[%s2512_s0] sm:$0xff] (!%p325_p2)  ;;  %v788_v20 = vld [vmem:[%s2516_s4 + $0x10] sm:$0xff] (!%p325_p2)  ;;  %v789_v22 = vld [vmem:[%s2516_s4 + $0x18] sm:$0xff] (!%p325_p2)  ;;  %vm790_vm2 = vcmask (!%p325_p2), 261120  }
   0x7   : > { %1793 = vmatpush3.msk.msra.mxu0 (!%p325_p2), %vm472_vm0, %v422_v0  ;;  %1850 = vmatprep.mubr.f32.mxu1 (!%p325_p2), %v2282_v17  ;;  %v786_v18 = vld [vmem:[%s2516_s4] sm:$0xff] (!%p325_p2)  ;;  %v2062_v23 = vpack.c.bf16 (!%p325_p2), %v789_v22, %v788_v20  ;;  %v2300_v48 = vld [vmem:[%s2512_s0 + $0x8] sm:$0xff] (!%p325_p2)  ;;  %v2305_v49 = vld [vmem:[%s2512_s0 + $0x10] sm:$0xff] (!%p325_p2)  ;;  %s2172_s26 = smov (!%p325_p2), 32   ;;  %vm1341_vm3 = vcmask (!%p325_p2), 130048   ;;  %vm1524_vm4 = vcmask (!%p325_p2), 392192  }
   0x8   : > { %v2058_v21 = vpack.c.bf16 (!%p325_p2), %v787_v19, %v786_v18  ;;  %v2312_v50 = vld [vmem:[%s2512_s0 + $0x18] sm:$0xff] (!%p325_p2)  ;;  %v2317_v51 = vld [vmem:[%s2512_s0 + $0x20] sm:$0xff] (!%p325_p2)  ;;  %v2324_v52 = vld [vmem:[%s2512_s0 + $0x28] sm:$0xff] (!%p325_p2)  ;;  %vm1527_vm5 = vcmask (!%p325_p2), 523264  }
   0x9   : > { %v2329_v53 = vld [vmem:[%s2512_s0 + $0x30] sm:$0xff] (!%p325_p2)  ;;  %v2336_v54 = vld [vmem:[%s2512_s0 + $0x38] sm:$0xff] (!%p325_p2)  ;;  %v2341_v55 = vld [vmem:[%s2512_s0 + $0x40] sm:$0xff] (!%p325_p2) }
   0xa   : > { %2059 = vmatprep.subr.bf16.mxu0 (!%p325_p2), %v2058_v21  ;;  %v2348_v56 = vld [vmem:[%s2512_s0 + $0x48] sm:$0xff] (!%p325_p2)  ;;  %v2353_v57 = vld [vmem:[%s2512_s0 + $0x50] sm:$0xff] (!%p325_p2)  ;;  %v2360_v58 = vld [vmem:[%s2512_s0 + $0x58] sm:$0xff] (!%p325_p2) }
   0xb   : > { %v2365_v59 = vld [vmem:[%s2512_s0 + $0x60] sm:$0xff] (!%p325_p2)  ;;  %v2372_v60 = vld [vmem:[%s2512_s0 + $0x68] sm:$0xff] (!%p325_p2)  ;;  %v2377_v61 = vld [vmem:[%s2512_s0 + $0x70] sm:$0xff] (!%p325_p2) }
   0xc   : > { %v2384_v62 = vld [vmem:[%s2512_s0 + $0x78] sm:$0xff] (!%p325_p2)  ;;  %v1628_v63 = vld [vmem:[%s2520_s8] ss:$0 sm:$0xff] (!%p325_p2) }
   0xd   : > { %s2524_s17 = smov (!%p368_p3, %s1605_s17), 31 }
   0xe   : > { %s1606_s18 = sshll.u32 %s2524_s17, 3  ;;  %s2173_s17 = smov 112  }
   0xf   : > { %s2245_s21 = scalar_lea.vmem %s2514_s2, %s1606_s18  ;;  %s1607_s18 = sshll.u32 %s1600_s14, 1 }
  0x10   : > { %v406_v1 = vld [vmem:[%s2245_s21] sm:$0xff]  ;;  %v407_v2 = vld [vmem:[%s2245_s21 + $0x8] sm:$0xff]  ;;  %v408_v3 = vld [vmem:[%s2245_s21 + $0x10] sm:$0xff]  ;;  %p374_p4 = scmp.lt.s32.totalorder %s1607_s18, 3 }
  0x11   : > { %1794 = vmatprep.mubr.msk.f32.mxu0 %vm423_vm1, %v406_v1  ;;  %v409_v4 = vld [vmem:[%s2245_s21 + $0x18] sm:$0xff]  ;;  %v410_v5 = vld [vmem:[%s2245_s21 + $0x20] sm:$0xff]  ;;  %v411_v6 = vld [vmem:[%s2245_s21 + $0x28] sm:$0xff] }
  0x12   : > { %1795 = vmatmul.mubr.msk.f32.vlgmr.msra.gmra.mrb[0].mxu0 %vm423_vm1, %v407_v2  ;;  %v412_v7 = vld [vmem:[%s2245_s21 + $0x30] sm:$0xff]  ;;  %v413_v8 = vld [vmem:[%s2245_s21 + $0x38] sm:$0xff]  ;;  %v414_v9 = vld [vmem:[%s2245_s21 + $0x40] sm:$0xff]  ;;  %s2526_s18 = smov (!%p374_p4, %s1607_s18), 3 }
  0x13   : > { %1797 = vmatprep.mubr.msk.f32.mxu0 %vm423_vm1, %v408_v3  ;;  %v415_v10 = vld [vmem:[%s2245_s21 + $0x48] sm:$0xff]  ;;  %v416_v11 = vld [vmem:[%s2245_s21 + $0x50] sm:$0xff]  ;;  %v417_v12 = vld [vmem:[%s2245_s21 + $0x58] sm:$0xff]  ;;  %2061 = vmatpush3.bf16.msra.mxu0 %v2058_v21  ;;  %s1608_s19 = sshll.u32 %s2526_s18, 3 }
  0x14   : > { %v418_v13 = vld [vmem:[%s2245_s21 + $0x60] sm:$0xff]  ;;  %v419_v14 = vld [vmem:[%s2245_s21 + $0x68] sm:$0xff]  ;;  %v420_v15 = vld [vmem:[%s2245_s21 + $0x70] sm:$0xff]  ;;  %2063 = vmatprep.subr.bf16.mxu0 %v2062_v23  ;;  %s377_s22 = scalar_lea.vmem %s2521_s9, %s1608_s19  ;;  %s383_s12 = scalar_lea.vmem %s2522_s10, %s1608_s19 }
  0x15   : > { %v421_v16 = vld [vmem:[%s2245_s21 + $0x78] sm:$0xff] }
  0x16   : > { %1798 = vmatmul.mubr.msk.f32.gmra.mrb[2].mxu0 %vm423_vm1, %v409_v4 }
  0x17   : > { %1800 = vmatprep.mubr.msk.f32.mxu0 %vm423_vm1, %v410_v5  ;;  %2065 = vmatpush3.bf16.msra.mxu0 %v2062_v23 }
  0x1a   : > { %1801 = vmatmul.mubr.msk.f32.gmra.mrb[4].mxu0 %vm423_vm1, %v411_v6 }
  0x1b   : > { %1803 = vmatprep.mubr.msk.f32.mxu0 %vm423_vm1, %v412_v7 }
  0x1e   : > { %1804 = vmatmul.mubr.msk.f32.gmra.mrb[6].mxu0 %vm423_vm1, %v413_v8 }
  0x1f   : > { %1806 = vmatprep.mubr.msk.f32.mxu0 %vm423_vm1, %v414_v9 }
  0x22   : > { %1807 = vmatmul.mubr.msk.f32.gmra.mrb[8].mxu0 %vm423_vm1, %v415_v10 }
  0x23   : > { %1809 = vmatprep.mubr.msk.f32.mxu0 %vm423_vm1, %v416_v11 }
  0x26   : > { %1810 = vmatmul.mubr.msk.f32.gmra.mrb[10].mxu0 %vm423_vm1, %v417_v12 }
  0x27   : > { %1812 = vmatprep.mubr.msk.f32.mxu0 %vm423_vm1, %v418_v13 }
  0x2a   : > { %1813 = vmatmul.mubr.msk.f32.gmra.mrb[12].mxu0 %vm423_vm1, %v419_v14 }
  0x2b   : > { %1815 = vmatprep.mubr.msk.f32.mxu0 %vm423_vm1, %v420_v15 }
  0x2e   : > { %1816 = vmatmul.mubr.msk.f32.gmra.mrb[14].mxu0 %vm423_vm1, %v421_v16 }
  0xe5   : > { %v1796_v24 = vpop.f32.mrb[0].mxu0 }
  0xe6   : > { %v542_v25 = vpop.f32.mrb[1].mxu0 }
  0xe7   : > { %v2026_v26 = vpack.c.bf16 %v1796_v24, %v542_v25 }
  0xe9   : > { %v1799_v27 = vpop.f32.mrb[2].mxu0  ;;  %2027 = vmatprep.subr.bf16.mxu1 %v2026_v26 }
  0xea   : > { %v552_v28 = vpop.f32.mrb[3].mxu0  ;;  %2029 = vmatpush3.bf16.msra.mxu1 %v2026_v26 }
  0xeb   : > { %v2030_v29 = vpack.c.bf16 %v1799_v27, %v552_v28 }
  0xed   : > { %v1802_v30 = vpop.f32.mrb[4].mxu0  ;;  %2031 = vmatprep.subr.bf16.mxu1 %v2030_v29 }
  0xee   : > { %v562_v31 = vpop.f32.mrb[5].mxu0  ;;  %2033 = vmatpush3.bf16.msra.mxu1 %v2030_v29 }
  0xef   : > { %v2034_v32 = vpack.c.bf16 %v1802_v30, %v562_v31 }
  0xf1   : > { %v1805_v33 = vpop.f32.mrb[6].mxu0  ;;  %2035 = vmatprep.subr.bf16.mxu1 %v2034_v32 }
  0xf2   : > { %v572_v34 = vpop.f32.mrb[7].mxu0  ;;  %2037 = vmatpush3.bf16.msra.mxu1 %v2034_v32 }
  0xf3   : > { %v2038_v35 = vpack.c.bf16 %v1805_v33, %v572_v34 }
  0xf5   : > { %v1808_v36 = vpop.f32.mrb[8].mxu0  ;;  %2039 = vmatprep.subr.bf16.mxu1 %v2038_v35 }
  0xf6   : > { %v582_v37 = vpop.f32.mrb[9].mxu0  ;;  %2041 = vmatpush3.bf16.msra.mxu1 %v2038_v35 }
  0xf7   : > { %v2042_v38 = vpack.c.bf16 %v1808_v36, %v582_v37 }
  0xf9   : > { %v1811_v39 = vpop.f32.mrb[10].mxu0  ;;  %2043 = vmatprep.subr.bf16.mxu1 %v2042_v38 }
  0xfa   : > { %v592_v40 = vpop.f32.mrb[11].mxu0  ;;  %2045 = vmatpush3.bf16.msra.mxu1 %v2042_v38 }
  0xfb   : > { %v2046_v41 = vpack.c.bf16 %v1811_v39, %v592_v40 }
  0xfd   : > { %v1814_v42 = vpop.f32.mrb[12].mxu0  ;;  %2047 = vmatprep.subr.bf16.mxu1 %v2046_v41 }
  0xfe   : > { %v602_v43 = vpop.f32.mrb[13].mxu0  ;;  %2049 = vmatpush3.bf16.msra.mxu1 %v2046_v41 }
  0xff   : > { %v2050_v44 = vpack.c.bf16 %v1814_v42, %v602_v43 }
 0x101   : > { %v1817_v45 = vpop.f32.mrb[14].mxu0  ;;  %2051 = vmatprep.subr.bf16.mxu1 %v2050_v44 }
 0x102   : > { %v612_v46 = vpop.f32.mrb[15].mxu0  ;;  %2053 = vmatpush3.bf16.msra.mxu1 %v2050_v44 }
 0x103   : > { %v2054_v47 = vpack.c.bf16 %v1817_v45, %v612_v46 }
 0x105   : > { %2055 = vmatprep.subr.bf16.mxu1 %v2054_v47 }
 0x106   : > { %2057 = vmatpush3.bf16.msra.mxu1 %v2054_v47 }
 0x109   : > { %1851 = vmatmul.mubr.f32.vlgmr.msra.gmra.mrb[0].mxu1 %v2300_v48 }
 0x10a   : > { %1853 = vmatprep.mubr.f32.mxu1 %v2305_v49 }
 0x10d   : > { %1854 = vmatmul.mubr.f32.gmra.mrb[2].mxu1 %v2312_v50 }
 0x10e   : > { %1856 = vmatprep.mubr.f32.mxu1 %v2317_v51 }
 0x111   : > { %1857 = vmatmul.mubr.f32.gmra.mrb[4].mxu1 %v2324_v52 }
 0x112   : > { %1859 = vmatprep.mubr.f32.mxu1 %v2329_v53 }
 0x115   : > { %1860 = vmatmul.mubr.f32.gmra.mrb[6].mxu1 %v2336_v54 }
 0x116   : > { %1862 = vmatprep.mubr.f32.mxu1 %v2341_v55 }
 0x119   : > { %1863 = vmatmul.mubr.f32.gmra.mrb[8].mxu1 %v2348_v56 }
 0x11a   : > { %1865 = vmatprep.mubr.f32.mxu1 %v2353_v57 }
 0x11d   : > { %1866 = vmatmul.mubr.f32.gmra.mrb[10].mxu1 %v2360_v58 }
 0x11e   : > { %1868 = vmatprep.mubr.f32.mxu1 %v2365_v59 }
 0x121   : > { %1869 = vmatmul.mubr.f32.gmra.mrb[12].mxu1 %v2372_v60 }
 0x122   : > { %1871 = vmatprep.mubr.f32.mxu1 %v2377_v61 }
 0x125   : > { %1872 = vmatmul.mubr.f32.gmra.mrb[14].mxu1 %v2384_v62 }
 0x126   : > { %1938 = vmatprep.mubr.f32.mxu1 %v2282_v17 }
 0x1dc   : > { %v1852_v0 = vpop.f32.mrb[0].mxu1 }
 0x1dd   : > { %v697_v1 = vadd.f32 %v1852_v0, %v1628_v63  ;;  %v691_v2 = vpop.f32.mrb[1].mxu1 }
 0x1de   : > { %v692_v3 = vadd.f32 %v1628_v63, %v691_v2 }
 0x1df   : > { %v771_v6 = vmax.f32 %v697_v1, 0.0 }
 0x1e0   : > { %v770_v4 = vmax.f32 %v692_v3, 0.0  ;;  %v1855_v5 = vpop.f32.mrb[2].mxu1 }
 0x1e1   : > { %v707_v7 = vadd.f32 %v1855_v5, %v1628_v63  ;;  %v701_v8 = vpop.f32.mrb[3].mxu1 }
 0x1e2   : > { %v702_v9 = vadd.f32 %v1628_v63, %v701_v8  ;;  %1882 = vmatprep.mubr.msk.f32.mxu0 %vm790_vm2, %v770_v4 }
 0x1e3   : > { %1883 = vmatmul.mubr.msk.f32.vlgmr.msra.gmra.mrb[16].mxu0 %vm790_vm2, %v771_v6  ;;  %v773_v12 = vmax.f32 %v707_v7, 0.0 }
 0x1e4   : > { %v772_v10 = vmax.f32 %v702_v9, 0.0  ;;  %v1858_v11 = vpop.f32.mrb[4].mxu1 }
 0x1e5   : > { %v717_v13 = vadd.f32 %v1858_v11, %v1628_v63  ;;  %v711_v14 = vpop.f32.mrb[5].mxu1 }
 0x1e6   : > { %v712_v15 = vadd.f32 %v1628_v63, %v711_v14  ;;  %1885 = vmatprep.mubr.msk.f32.mxu0 %vm790_vm2, %v772_v10 }
 0x1e7   : > { %1886 = vmatmul.mubr.msk.f32.gmra.mrb[18].mxu0 %vm790_vm2, %v773_v12  ;;  %v775_v18 = vmax.f32 %v717_v13, 0.0 }
 0x1e8   : > { %v774_v16 = vmax.f32 %v712_v15, 0.0  ;;  %v1861_v17 = vpop.f32.mrb[6].mxu1 }
 0x1e9   : > { %v727_v19 = vadd.f32 %v1861_v17, %v1628_v63  ;;  %v721_v20 = vpop.f32.mrb[7].mxu1 }
 0x1ea   : > { %v722_v21 = vadd.f32 %v1628_v63, %v721_v20  ;;  %1888 = vmatprep.mubr.msk.f32.mxu0 %vm790_vm2, %v774_v16 }
 0x1eb   : > { %1889 = vmatmul.mubr.msk.f32.gmra.mrb[20].mxu0 %vm790_vm2, %v775_v18  ;;  %v777_v24 = vmax.f32 %v727_v19, 0.0 }
 0x1ec   : > { %v776_v22 = vmax.f32 %v722_v21, 0.0  ;;  %v1864_v23 = vpop.f32.mrb[8].mxu1 }
 0x1ed   : > { %v737_v25 = vadd.f32 %v1864_v23, %v1628_v63  ;;  %v731_v26 = vpop.f32.mrb[9].mxu1 }
 0x1ee   : > { %v732_v27 = vadd.f32 %v1628_v63, %v731_v26  ;;  %1891 = vmatprep.mubr.msk.f32.mxu0 %vm790_vm2, %v776_v22 }
 0x1ef   : > { %1892 = vmatmul.mubr.msk.f32.gmra.mrb[22].mxu0 %vm790_vm2, %v777_v24  ;;  %v779_v30 = vmax.f32 %v737_v25, 0.0 }
 0x1f0   : > { %v778_v28 = vmax.f32 %v732_v27, 0.0  ;;  %v1867_v29 = vpop.f32.mrb[10].mxu1 }
 0x1f1   : > { %v747_v31 = vadd.f32 %v1867_v29, %v1628_v63  ;;  %v741_v32 = vpop.f32.mrb[11].mxu1 }
 0x1f2   : > { %v742_v33 = vadd.f32 %v1628_v63, %v741_v32  ;;  %1894 = vmatprep.mubr.msk.f32.mxu0 %vm790_vm2, %v778_v28 }
 0x1f3   : > { %1895 = vmatmul.mubr.msk.f32.gmra.mrb[24].mxu0 %vm790_vm2, %v779_v30  ;;  %v781_v36 = vmax.f32 %v747_v31, 0.0 }
 0x1f4   : > { %v780_v34 = vmax.f32 %v742_v33, 0.0  ;;  %v1870_v35 = vpop.f32.mrb[12].mxu1 }
 0x1f5   : > { %v757_v37 = vadd.f32 %v1870_v35, %v1628_v63  ;;  %v751_v38 = vpop.f32.mrb[13].mxu1 }
 0x1f6   : > { %v752_v39 = vadd.f32 %v1628_v63, %v751_v38  ;;  %1897 = vmatprep.mubr.msk.f32.mxu0 %vm790_vm2, %v780_v34 }
 0x1f7   : > { %1898 = vmatmul.mubr.msk.f32.gmra.mrb[26].mxu0 %vm790_vm2, %v781_v36  ;;  %v783_v42 = vmax.f32 %v757_v37, 0.0 }
 0x1f8   : > { %v782_v40 = vmax.f32 %v752_v39, 0.0  ;;  %v1873_v41 = vpop.f32.mrb[14].mxu1 }
 0x1f9   : > { %v767_v43 = vadd.f32 %v1873_v41, %v1628_v63  ;;  %v761_v44 = vpop.f32.mrb[15].mxu1 }
 0x1fa   : > { %v762_v45 = vadd.f32 %v1628_v63, %v761_v44  ;;  %1900 = vmatprep.mubr.msk.f32.mxu0 %vm790_vm2, %v782_v40 }
 0x1fb   : > { %1901 = vmatmul.mubr.msk.f32.gmra.mrb[28].mxu0 %vm790_vm2, %v783_v42  ;;  %v785_v47 = vmax.f32 %v767_v43, 0.0 }
 0x1fc   : > { %v784_v46 = vmax.f32 %v762_v45, 0.0 }
 0x1fe   : > { %1903 = vmatprep.mubr.msk.f32.mxu0 %vm790_vm2, %v784_v46 }
 0x1ff   : > { %1904 = vmatmul.mubr.msk.f32.gmra.mrb[30].mxu0 %vm790_vm2, %v785_v47 }
 0x2b6   : > { %v1884_v0 = vpop.f32.mrb[16].mxu0 }
 0x2b7   : > { %v905_v1 = vpop.f32.mrb[17].mxu0 }
 0x2b8   : > { %v2066_v2 = vpack.c.bf16 %v1884_v0, %v905_v1 }
 0x2ba   : > { %v1887_v3 = vpop.f32.mrb[18].mxu0  ;;  %2067 = vmatprep.subr.bf16.mxu1 %v2066_v2 }
 0x2bb   : > { %v915_v4 = vpop.f32.mrb[19].mxu0  ;;  %2069 = vmatpush3.bf16.msra.mxu1 %v2066_v2 }
 0x2bc   : > { %v2070_v5 = vpack.c.bf16 %v1887_v3, %v915_v4 }
 0x2be   : > { %v1890_v6 = vpop.f32.mrb[20].mxu0  ;;  %2071 = vmatprep.subr.bf16.mxu1 %v2070_v5 }
 0x2bf   : > { %v925_v63 = vpop.f32.mrb[21].mxu0  ;;  %2073 = vmatpush3.bf16.msra.mxu1 %v2070_v5 }
 0x2c0   : > { %v2074_v7 = vpack.c.bf16 %v1890_v6, %v925_v63 }
 0x2c2   : > { %v1893_v8 = vpop.f32.mrb[22].mxu0  ;;  %2075 = vmatprep.subr.bf16.mxu1 %v2074_v7 }
 0x2c3   : > { %v935_v9 = vpop.f32.mrb[23].mxu0  ;;  %2077 = vmatpush3.bf16.msra.mxu1 %v2074_v7 }
 0x2c4   : > { %v2078_v10 = vpack.c.bf16 %v1893_v8, %v935_v9 }
 0x2c6   : > { %v1896_v11 = vpop.f32.mrb[24].mxu0  ;;  %2079 = vmatprep.subr.bf16.mxu1 %v2078_v10 }
 0x2c7   : > { %v945_v12 = vpop.f32.mrb[25].mxu0  ;;  %2081 = vmatpush3.bf16.msra.mxu1 %v2078_v10 }
 0x2c8   : > { %v2082_v13 = vpack.c.bf16 %v1896_v11, %v945_v12 }
 0x2ca   : > { %v1899_v14 = vpop.f32.mrb[26].mxu0  ;;  %2083 = vmatprep.subr.bf16.mxu1 %v2082_v13 }
 0x2cb   : > { %v955_v15 = vpop.f32.mrb[27].mxu0  ;;  %2085 = vmatpush3.bf16.msra.mxu1 %v2082_v13 }
 0x2cc   : > { %v2086_v16 = vpack.c.bf16 %v1899_v14, %v955_v15  ;;  %v1226_v15 = vld [vmem:[%s2517_s5] sm:$0xff] }
 0x2ce   : > { %v1902_v17 = vpop.f32.mrb[28].mxu0  ;;  %2087 = vmatprep.subr.bf16.mxu1 %v2086_v16 }
 0x2cf   : > { %v965_v18 = vpop.f32.mrb[29].mxu0  ;;  %2089 = vmatpush3.bf16.msra.mxu1 %v2086_v16  ;;  %v1227_v16 = vld [vmem:[%s2517_s5 + $0x8] sm:$0xff] }
 0x2d0   : > { %v2090_v19 = vpack.c.bf16 %v1902_v17, %v965_v18 }
 0x2d2   : > { %v1905_v20 = vpop.f32.mrb[30].mxu0  ;;  %2091 = vmatprep.subr.bf16.mxu1 %v2090_v19 }
 0x2d3   : > { %v975_v21 = vpop.f32.mrb[31].mxu0  ;;  %2093 = vmatpush3.bf16.msra.mxu1 %v2090_v19  ;;  %v2130_v19 = vpack.c.bf16 %v1227_v16, %v1226_v15 }
 0x2d4   : > { %v2094_v22 = vpack.c.bf16 %v1905_v20, %v975_v21  ;;  %v1228_v20 = vld [vmem:[%s2517_s5 + $0x10] sm:$0xff]  ;;  %v1229_v21 = vld [vmem:[%s2517_s5 + $0x18] sm:$0xff] }
 0x2d6   : > { %2095 = vmatprep.subr.bf16.mxu1 %v2094_v22 }
 0x2d7   : > { %2097 = vmatpush3.bf16.msra.mxu1 %v2094_v22  ;;  %v1150_v22 = vld [vmem:[%s2513_s1 + $0x8] sm:$0xff] }
 0x2da   : > { %1939 = vmatmul.mubr.f32.vlgmr.msra.gmra.mrb[16].mxu1 %v2300_v48  ;;  %v1149_v48 = vld [vmem:[%s2513_s1] sm:$0xff] }
 0x2db   : > { %1941 = vmatprep.mubr.f32.mxu1 %v2305_v49  ;;  %1994 = vmatprep.mubr.f32.mxu0 %v1149_v48  ;;  %v2428_v49 = vld [vmem:[%s2520_s8 + $0x1] ss:$0 sm:$0xff]  ;;  %v2134_v48 = vpack.c.bf16 %v1229_v21, %v1228_v20 }
 0x2de   : > { %1942 = vmatmul.mubr.f32.gmra.mrb[18].mxu1 %v2312_v50 }
 0x2df   : > { %1944 = vmatprep.mubr.f32.mxu1 %v2317_v51 }
 0x2e2   : > { %1945 = vmatmul.mubr.f32.gmra.mrb[20].mxu1 %v2324_v52 }
 0x2e3   : > { %1947 = vmatprep.mubr.f32.mxu1 %v2329_v53 }
 0x2e6   : > { %1948 = vmatmul.mubr.f32.gmra.mrb[22].mxu1 %v2336_v54 }
 0x2e7   : > { %1950 = vmatprep.mubr.f32.mxu1 %v2341_v55 }
 0x2ea   : > { %1951 = vmatmul.mubr.f32.gmra.mrb[24].mxu1 %v2348_v56 }
 0x2eb   : > { %1953 = vmatprep.mubr.f32.mxu1 %v2353_v57 }
 0x2ee   : > { %1954 = vmatmul.mubr.f32.gmra.mrb[26].mxu1 %v2360_v58 }
 0x2ef   : > { %1956 = vmatprep.mubr.f32.mxu1 %v2365_v59 }
 0x2f2   : > { %1957 = vmatmul.mubr.f32.gmra.mrb[28].mxu1 %v2372_v60 }
 0x2f3   : > { %1959 = vmatprep.mubr.f32.mxu1 %v2377_v61 }
 0x2f6   : > { %1960 = vmatmul.mubr.f32.gmra.mrb[30].mxu1 %v2384_v62 }
 0x3ad   : > { %v1940_v50 = vpop.f32.mrb[16].mxu1 }
 0x3ae   : > { %v1060_v51 = vadd.f32 %v1940_v50, %v2428_v49  ;;  %v1054_v52 = vpop.f32.mrb[17].mxu1 }
 0x3af   : > { %v1055_v53 = vadd.f32 %v2428_v49, %v1054_v52 }
 0x3b0   : > { %v1134_v54 = vmax.f32 %v1060_v51, 0.0  ;;  %v1646_v51 = vld [vmem:[%s2520_s8 + $0x2] ss:$0 sm:$0xff] }
 0x3b1   : > { %v1133_v55 = vmax.f32 %v1055_v53, 0.0  ;;  %v1943_v56 = vpop.f32.mrb[18].mxu1 }
 0x3b2   : > { %v1070_v57 = vadd.f32 %v1943_v56, %v2428_v49  ;;  %v1064_v58 = vpop.f32.mrb[19].mxu1 }
 0x3b3   : > { %v2098_v59 = vpack.c.bf16 %v1134_v54, %v1133_v55  ;;  %v1065_v60 = vadd.f32 %v2428_v49, %v1064_v58 }
 0x3b4   : > { %v1136_v61 = vmax.f32 %v1070_v57, 0.0 }
 0x3b5   : > { %v1135_v62 = vmax.f32 %v1065_v60, 0.0  ;;  %v1946_v23 = vpop.f32.mrb[20].mxu1  ;;  %2099 = vmatprep.subr.bf16.mxu0 %v2098_v59  ;;  %v1336_v60 = vld [vmem:[%s2518_s6 + $0x8] sm:$0xff] }
 0x3b6   : > { %v1080_v24 = vadd.f32 %v1946_v23, %v2428_v49  ;;  %v1074_v25 = vpop.f32.mrb[21].mxu1  ;;  %2101 = vmatpush3.bf16.msra.mxu0 %v2098_v59  ;;  %v1335_v59 = vld [vmem:[%s2518_s6] sm:$0xff] }
 0x3b7   : > { %v2102_v26 = vpack.c.bf16 %v1136_v61, %v1135_v62  ;;  %v1075_v27 = vadd.f32 %v2428_v49, %v1074_v25  ;;  %v2138_v62 = vpack.c.bf16 %v1336_v60, %v1335_v59  ;;  %v1425_v23 = vld [vmem:[%s2519_s7] sm:$0xff] }
 0x3b8   : > { %v1138_v28 = vmax.f32 %v1080_v24, 0.0  ;;  %v1426_v24 = vld [vmem:[%s2519_s7 + $0x8] sm:$0xff] }
 0x3b9   : > { %v1137_v29 = vmax.f32 %v1075_v27, 0.0  ;;  %v1949_v30 = vpop.f32.mrb[22].mxu1  ;;  %2103 = vmatprep.subr.bf16.mxu0 %v2102_v26  ;;  %v2142_v25 = vpack.c.bf16 %v1426_v24, %v1425_v23 }
 0x3ba   : > { %v1090_v31 = vadd.f32 %v1949_v30, %v2428_v49  ;;  %v1084_v32 = vpop.f32.mrb[23].mxu1  ;;  %2105 = vmatpush3.bf16.msra.mxu0 %v2102_v26 }
 0x3bb   : > { %v2106_v33 = vpack.c.bf16 %v1138_v28, %v1137_v29  ;;  %v1085_v34 = vadd.f32 %v2428_v49, %v1084_v32  ;;  %v1315_v28 = vld [vmem:[%s377_s22] sm:$0xff] }
 0x3bc   : > { %v1140_v35 = vmax.f32 %v1090_v31, 0.0  ;;  %v1316_v31 = vld [vmem:[%s377_s22 + $0x8] sm:$0xff] }
 0x3bd   : > { %v1139_v36 = vmax.f32 %v1085_v34, 0.0  ;;  %v1952_v37 = vpop.f32.mrb[24].mxu1  ;;  %2107 = vmatprep.subr.bf16.mxu0 %v2106_v33 }
 0x3be   : > { %v1100_v38 = vadd.f32 %v1952_v37, %v2428_v49  ;;  %v1094_v39 = vpop.f32.mrb[25].mxu1  ;;  %2109 = vmatpush3.bf16.msra.mxu0 %v2106_v33  ;;  %v1428_v37 = vld [vmem:[%s2519_s7 + $0x18] sm:$0xff] }
 0x3bf   : > { %v2110_v40 = vpack.c.bf16 %v1140_v35, %v1139_v36  ;;  %v1095_v41 = vadd.f32 %v2428_v49, %v1094_v39  ;;  %v1427_v36 = vld [vmem:[%s2519_s7 + $0x10] sm:$0xff]  ;;  %v1649_v39 = vld [vmem:[%s2520_s8 + $0x3] ss:$0 sm:$0xff] }
 0x3c0   : > { %v1142_v42 = vmax.f32 %v1100_v38, 0.0  ;;  %v2146_v38 = vpack.c.bf16 %v1428_v37, %v1427_v36 }
 0x3c1   : > { %v1141_v43 = vmax.f32 %v1095_v41, 0.0  ;;  %v1955_v44 = vpop.f32.mrb[26].mxu1  ;;  %2111 = vmatprep.subr.bf16.mxu0 %v2110_v40 }
 0x3c2   : > { %v1110_v45 = vadd.f32 %v1955_v44, %v2428_v49  ;;  %v1104_v46 = vpop.f32.mrb[27].mxu1  ;;  %2113 = vmatpush3.bf16.msra.mxu0 %v2110_v40 }
 0x3c3   : > { %v2114_v47 = vpack.c.bf16 %v1142_v42, %v1141_v43  ;;  %v1105_v0 = vadd.f32 %v2428_v49, %v1104_v46 }
 0x3c4   : > { %v1144_v1 = vmax.f32 %v1110_v45, 0.0 }
 0x3c5   : > { %v1143_v2 = vmax.f32 %v1105_v0, 0.0  ;;  %v1958_v3 = vpop.f32.mrb[28].mxu1  ;;  %2115 = vmatprep.subr.bf16.mxu0 %v2114_v47 }
 0x3c6   : > { %v1120_v4 = vadd.f32 %v1958_v3, %v2428_v49  ;;  %v1114_v5 = vpop.f32.mrb[29].mxu1  ;;  %2117 = vmatpush3.bf16.msra.mxu0 %v2114_v47  ;;  %v1652_v47 = vld [vmem:[%s2520_s8 + $0x4] ss:$0 sm:$0xff] }
 0x3c7   : > { %v2118_v6 = vpack.c.bf16 %v1144_v1, %v1143_v2  ;;  %v1115_v63 = vadd.f32 %v2428_v49, %v1114_v5 }
 0x3c8   : > { %v1146_v7 = vmax.f32 %v1120_v4, 0.0 }
 0x3c9   : > { %v1145_v8 = vmax.f32 %v1115_v63, 0.0  ;;  %v1961_v9 = vpop.f32.mrb[30].mxu1  ;;  %2119 = vmatprep.subr.bf16.mxu0 %v2118_v6 }
 0x3ca   : > { %v1130_v10 = vadd.f32 %v1961_v9, %v2428_v49  ;;  %v1124_v11 = vpop.f32.mrb[31].mxu1  ;;  %2121 = vmatpush3.bf16.msra.mxu0 %v2118_v6 }
 0x3cb   : > { %v2122_v12 = vpack.c.bf16 %v1146_v7, %v1145_v8  ;;  %v1125_v13 = vadd.f32 %v2428_v49, %v1124_v11 }
 0x3cc   : > { %v1148_v14 = vmax.f32 %v1130_v10, 0.0 }
 0x3cd   : > { %v1147_v17 = vmax.f32 %v1125_v13, 0.0  ;;  %2123 = vmatprep.subr.bf16.mxu0 %v2122_v12 }
 0x3ce   : > { %2125 = vmatpush3.bf16.msra.mxu0 %v2122_v12 }
 0x3cf   : > { %v2126_v18 = vpack.c.bf16 %v1148_v14, %v1147_v17 }
 0x3d1   : > { %2127 = vmatprep.subr.bf16.mxu0 %v2126_v18 }
 0x3d2   : > { %2129 = vmatpush3.bf16.msra.mxu0 %v2126_v18 }
 0x3d3   : > { %2131 = vmatprep.subr.bf16.mxu0 %v2130_v19 }
 0x3d5   : > { %1995 = vmatmul.mubr.f32.vlgmr.msra.gmra.mrb[32].mxu0 %v1150_v22 }
 0x3d6   : > { %2133 = vmatpush3.bf16.msra.mxu0 %v2130_v19 }
 0x3d7   : > { %2135 = vmatprep.subr.bf16.mxu0 %v2134_v48 }
 0x3da   : > { %2137 = vmatpush3.bf16.msra.mxu0 %v2134_v48 }
 0x3db   : > { %2139 = vmatprep.subr.bf16.mxu0 %v2138_v62 }
 0x4a8   : > { %v1996_v49 = vpop.f32.mrb[32].mxu0 }
 0x4a9   : > { %v1217_v50 = vpop.f32.mrb[33].mxu0 }
 0x4aa   : > { %2005 = vmatprep.mubr.msk.f32.mxu0 %vm790_vm2, %v1217_v50 }
 0x4ab   : > { %2006 = vmatmul.mubr.msk.f32.vlgmr.msra.gmra.mrb[34].mxu0 %vm790_vm2, %v1996_v49 }
 0x4ac   : > { %2141 = vmatpush3.bf16.msra.mxu0 %v2138_v62 }
 0x4ad   : > { %2143 = vmatprep.subr.bf16.mxu0 %v2142_v25 }
 0x57e   : > { %v2007_v52 = vpop.f32.mrb[34].mxu0 }
 0x57f   : > { %v1312_v53 = vadd.f32 %v2007_v52, %v1646_v51  ;;  %v1306_v54 = vpop.f32.mrb[35].mxu0 }
 0x580   : > { %v1307_v55 = vadd.f32 %v1646_v51, %v1306_v54 }
 0x581   : > { %v1318_v56 = vmul.f32 0.5, %v1312_v53 }
 0x582   : > { %v1317_v57 = vmul.f32 0.5, %v1307_v55  ;;  %1516 = vrot.lane.b32.xlu1 %v1307_v55, %s2172_s26 }
 0x583   : > { %v1321_v61 = vmul.f32 1.442695, %v1318_v56 }
 0x584   : > { %v1319_v58 = vmul.f32 1.442695, %v1317_v57 }
 0x586   : > { %2160 = vpow2.f32 %v1319_v58  ;;  %1518 = vrot.lane.b32.xlu1 %v1312_v53, %s2172_s26 }
 0x587   : > { %2162 = vpow2.f32 %v1321_v61 }
 0x590   : > { %v2161_v26 = vpop.eup %2160 }
 0x591   : > { %1325 = vrot.lane.b32.xlu0 %v2161_v26, %s2173_s17  ;;  %v2163_v27 = vpop.eup %2162 }
 0x595   : > { %1327 = vrot.lane.b32.xlu0 %v2163_v27, %s2173_s17 }
 0x5f4   : > { %v1517_v46 = vpop.permute.xlu1 %1516 }
 0x5f8   : > { %v1519_v3 = vpop.permute.xlu1 %1518 }
 0x603   : > { %v1326_v29 = vpop.permute.xlu0 %1325 }
 0x604   : > { %v1331_v30 = vmul.f32 %v1326_v29, %v1315_v28 }
 0x606   : > { %v1333_v32 = vadd.f32 %v1331_v30, %v1307_v55 }
 0x607   : > { %v1328_v33 = vpop.permute.xlu0 %1327 }
 0x608   : > { %v1332_v34 = vmul.f32 %v1328_v33, %v1316_v31  ;;  %2012 = vmatprep.mubr.msk.f32.mxu0 %vm1341_vm3, %v1333_v32 }
 0x60a   : > { %v1334_v35 = vadd.f32 %v1332_v34, %v1312_v53 }
 0x60c   : > { %2013 = vmatmul.mubr.msk.f32.vlgmr.msra.gmra.mrb[36].mxu0 %vm1341_vm3, %v1334_v35 }
 0x60d   : > { %2145 = vmatpush3.bf16.msra.mxu0 %v2142_v25 }
 0x60e   : > { %2147 = vmatprep.subr.bf16.mxu0 %v2146_v38 }
 0x611   : > { %2149 = vmatpush3.bf16.msra.mxu0 %v2146_v38 }
 0x6df   : > { %v2014_v40 = vpop.f32.mrb[36].mxu0 }
 0x6e0   : > { %v1420_v41 = vadd.f32 %v2014_v40, %v1649_v39  ;;  %v1414_v42 = vpop.f32.mrb[37].mxu0 }
 0x6e1   : > { %v1415_v43 = vadd.f32 %v1649_v39, %v1414_v42 }
 0x6e2   : > { %v1424_v45 = vmax.f32 %v1420_v41, 0.0 }
 0x6e3   : > { %v1423_v44 = vmax.f32 %v1415_v43, 0.0 }
 0x6e5   : > { %2023 = vmatprep.mubr.msk.f32.mxu0 %vm790_vm2, %v1423_v44 }
 0x6e6   : > { %2024 = vmatmul.mubr.msk.f32.vlgmr.msra.gmra.mrb[38].mxu0 %vm790_vm2, %v1424_v45 }
 0x7b9   : > { %v2025_v0 = vpop.f32.mrb[38].mxu0 }
 0x7ba   : > { %v1511_v1 = vadd.f32 %v2025_v0, %v1652_v47  ;;  %v1505_v2 = vpop.f32.mrb[39].mxu0 }
 0x7bb   : > { %v1506_v4 = vadd.f32 %v1652_v47, %v1505_v2 }
 0x7bc   : > { %v1523_v5 = vsel %vm790_vm2, %v1511_v1, %v1519_v3 }
 0x7bd   : > { %v1526_v6 = vsel %vm1524_vm4, %v1523_v5, %v1519_v3  ;;  %v1522_v63 = vsel %vm790_vm2, %v1506_v4, %v1517_v46 }
 0x7be   : > { %v1525_v7 = vsel %vm1524_vm4, %v1522_v63, %v1517_v46  ;;  %v1529_v9 = vsel %vm1527_vm5, %v1526_v6, 0.0 }
 0x7bf   : > { %v1528_v8 = vsel %vm1527_vm5, %v1525_v7, 0.0  ;;  %1531 = vst [vmem:[%s383_s12 + $0x8] sm:$0xff] %v1529_v9 }
 0x7c0   : > { %1530 = vst [vmem:[%s383_s12] sm:$0xff] %v1528_v8 }
 0x7c1 PF: > { %s20_s13 = sadd.s32 1, %s2170_s13  }
 0x7c2   : > { %p17_p5 = scmp.ge.s32.totalorder %s20_s13, 4  }
 0x7c4   :  { %19 = sbr.rel (!%p17_p5) target bundleno = 1 (0x1), region = 93 }

</bundles_post_ra>
